<compile_context>
chip_gen: v7x
topology: tpu7x:2x2x1
jax: 0.10.0
libtpu: 0.0.40
codegen_flags: <defaults>
</compile_context>

<pallas_src>
import functools

import jax
import jax.numpy as jnp
from jax.experimental import pallas as pl
from jax.experimental.pallas import tpu as pltpu


def _round_up(x, m):
    return ((x + m - 1) // m) * m


def _lstm_recurrent_kernel(x_ref, wih_ref, whh_ref, b_ref, hseq_ref,
                           h_ref, c_ref, *, hidden, chunk):
    """Fused LSTM over one (batch-chunk, time-chunk) tile.

    x_ref    : (TC, Bb, I)   time-major input block (matmul dtype)
    wih_ref  : (I, Gp)       input weights, gates concatenated, padded to Gp
    whh_ref  : (H, Gp)       recurrent weights, same layout
    b_ref    : (1, Gp)  f32  combined bias (b_ih + b_hh)
    hseq_ref : (TC, Bb, H)   per-step hidden states (output)
    h_ref, c_ref : (Bb, H) f32  VMEM scratch carried across the time axis

    Gate g lives at columns [g*H, (g+1)*H) of the Gp-wide gate vector
    (PyTorch order i, f, g, o).  Carried state is reset at program_id(1)==0;
    this is only valid because the time axis is the innermost, "arbitrary"
    grid axis -- do not reorder the grid.
    """
    H = hidden

    @pl.when(pl.program_id(1) == 0)
    def _():
        h_ref[...] = jnp.zeros_like(h_ref)
        c_ref[...] = jnp.zeros_like(c_ref)

    def sigmoid(v):                       # one EUP op instead of exp+divide
        return 0.5 * jnp.tanh(0.5 * v) + 0.5

    def step(s, carry):
        h_prev = h_ref[...]               # f32 carries
        c_prev = c_ref[...]
        # Weights are read from VMEM inside the loop so Mosaic can stream them
        # instead of pinning a large value across the fully unrolled loop.
        gates = (
            jnp.dot(x_ref[s], wih_ref[...], preferred_element_type=jnp.float32)
            + b_ref[...]
            + jnp.dot(h_prev.astype(whh_ref.dtype), whh_ref[...],
                      preferred_element_type=jnp.float32)
        )
        i_g = sigmoid(gates[:, 0 * H:1 * H])
        f_g = sigmoid(gates[:, 1 * H:2 * H])
        g_g = jnp.tanh(gates[:, 2 * H:3 * H])
        o_g = sigmoid(gates[:, 3 * H:4 * H])
        c_new = f_g * c_prev + i_g * g_g
        h_new = o_g * jnp.tanh(c_new)
        c_ref[...] = c_new
        h_ref[...] = h_new
        hseq_ref[s] = h_new.astype(hseq_ref.dtype)
        return carry

    # Fully unrolled: amortizes per-grid-step overhead over `chunk` time steps
    # and lets the scheduler overlap the (h-independent) input projections.
    jax.lax.fori_loop(0, chunk, step, 0, unroll=True)


def _vmem_limit_bytes(tc, bb, i_sz, h_sz, gp, x_isz, out_isz, w_isz):
    """Generation-aware scoped-VMEM budget (never below the actual need)."""
    need = (2 * tc * bb * i_sz * x_isz          # double-buffered x blocks
            + 2 * tc * bb * h_sz * out_isz      # double-buffered h_seq blocks
            + 2 * (i_sz + h_sz) * gp * w_isz    # resident weight buffers
            + 2 * gp * 4                        # bias buffers
            + 2 * bb * h_sz * 4)                # f32 h/c carries
    try:
        info = pltpu.get_tpu_info()
        phys = int(getattr(info, "vmem_capacity_bytes", 64 * 1024 * 1024))
    except Exception:                           # defensive: CPU/interpret etc.
        phys = 64 * 1024 * 1024                 # v7x per-core physical VMEM
    cap = (phys // 8) * 7                       # leave headroom for Mosaic
    return int(min(max(2 * need + (4 << 20), 32 << 20), cap))


def full_video_lstm_forward(x, params, *, time_chunk=32, batch_chunk=None,
                            matmul_dtype=jnp.float32):
    """Forward pass of FullVideoLstm.

    x: (B, T, I) or (B, T, Hs, Ws) float32
    params: w_ih (4H, I), w_hh (4H, H), b_ih (4H,), b_hh (4H,),
            w_fc (O, H), b_fc (O,)
    returns: (B, T, O) float32
    """
    if x.ndim == 4:
        x = x.reshape(x.shape[0], x.shape[1], -1)     # flatten(start_dim=2)
    B, T, I = x.shape
    H = params["w_hh"].shape[1]
    O = params["w_fc"].shape[0]
    f32 = jnp.float32

    G = 4 * H
    Gp = _round_up(G, 128)                 # concatenated gates, minimal pad

    # Fat MXU M-dimension: up to 256 batch rows per chunk (multiple of 8),
    # sized so a small batch is not padded past the next sublane multiple.
    if batch_chunk is None:
        n_chunks = -(-B // 256)
        batch_chunk = min(256, _round_up(-(-B // n_chunks), 8))
    assert batch_chunk % 8 == 0, "batch_chunk must be a multiple of 8 sublanes"
    Bb = batch_chunk
    Bp = _round_up(B, Bb)
    TC = max(1, min(time_chunk, T))
    Tp = _round_up(T, TC)
    n_bc = Bp // Bb
    n_tc = Tp // TC

    # ---- weight layout: gates concatenated (gate g at cols [g*H,(g+1)*H)),
    # total padded G -> Gp; padded columns carry zero weight/bias. ----------
    w_ih = params["w_ih"].astype(f32)                              # (4H, I)
    w_hh = params["w_hh"].astype(f32)                              # (4H, H)
    bias = (params["b_ih"] + params["b_hh"]).astype(f32)           # (4H,)

    w_ih_k = jnp.zeros((I, Gp), f32).at[:, :G].set(w_ih.T).astype(matmul_dtype)
    w_hh_k = jnp.zeros((H, Gp), f32).at[:, :G].set(w_hh.T).astype(matmul_dtype)
    b_k = jnp.zeros((1, Gp), f32).at[0, :G].set(bias)              # stays f32

    # ---- pad + time-major x (x is the smallest stream; no gx pad copy) ----
    x_t = jnp.zeros((Tp, Bp, I), matmul_dtype)
    x_t = x_t.at[:T, :B, :].set(
        jnp.transpose(x, (1, 0, 2)).astype(matmul_dtype))

    kernel = functools.partial(_lstm_recurrent_kernel, hidden=H, chunk=TC)

    x_isz = jnp.dtype(matmul_dtype).itemsize
    out_isz = jnp.dtype(matmul_dtype).itemsize
    w_isz = jnp.dtype(matmul_dtype).itemsize
    vmem_limit = _vmem_limit_bytes(TC, Bb, I, H, Gp, x_isz, out_isz, w_isz)

    cost = pl.CostEstimate(
        flops=int(2 * Tp * Bp * (I + H) * Gp),
        transcendentals=int(5 * Tp * Bp * H),
        bytes_accessed=int(Tp * Bp * I * x_isz
                           + (I + H) * Gp * w_isz + Gp * 4
                           + Tp * Bp * H * out_isz),
    )

    h_seq = pl.pallas_call(
        kernel,
        # bf16 h_seq halves the writeback stream when matmul_dtype is bf16.
        out_shape=jax.ShapeDtypeStruct((Tp, Bp, H), matmul_dtype),
        grid_spec=pltpu.PrefetchScalarGridSpec(
            num_scalar_prefetch=0,
            # Invariant: time axis MUST stay innermost + "arbitrary" because
            # the h/c scratch is reset on program_id(1) == 0.
            grid=(n_bc, n_tc),
            in_specs=[
                pl.BlockSpec((TC, Bb, I), lambda bc, tc: (tc, bc, 0)),
                pl.BlockSpec((I, Gp), lambda bc, tc: (0, 0)),
                pl.BlockSpec((H, Gp), lambda bc, tc: (0, 0)),
                pl.BlockSpec((1, Gp), lambda bc, tc: (0, 0)),
            ],
            out_specs=pl.BlockSpec((TC, Bb, H), lambda bc, tc: (tc, bc, 0)),
            scratch_shapes=[
                pltpu.VMEM((Bb, H), f32),      # h carry
                pltpu.VMEM((Bb, H), f32),      # c carry
            ],
        ),
        compiler_params=pltpu.CompilerParams(
            # batch chunks are independent (megacore-shardable); time carries
            # state through the VMEM scratch -> arbitrary.
            dimension_semantics=("parallel", "arbitrary"),
            vmem_limit_bytes=vmem_limit,
        ),
        cost_estimate=cost,
    )(x_t, w_ih_k, w_hh_k, b_k)

    # ---- hoisted FC head: tiny (T*B,H)@(H,O) matmul outside the kernel -----
    h_real = h_seq[:T, :B, :]                                      # (T, B, H)
    out = jnp.einsum("tbh,oh->bto",
                     h_real.astype(matmul_dtype),
                     params["w_fc"].astype(matmul_dtype),
                     preferred_element_type=f32) + params["b_fc"].astype(f32)
    return out                                                     # (B, T, O)


def _reference_forward(x, params):
    """Pure-JAX reference (same math) for correctness checking."""
    if x.ndim == 4:
        x = x.reshape(x.shape[0], x.shape[1], -1)
    B, T, I = x.shape
    H = params["w_hh"].shape[1]
    w_ih, w_hh = params["w_ih"], params["w_hh"]
    b = params["b_ih"] + params["b_hh"]

    def step(carry, x_t):
        h, c = carry
        gates = x_t @ w_ih.T + h @ w_hh.T + b
        i = jax.nn.sigmoid(gates[:, 0 * H:1 * H])
        f = jax.nn.sigmoid(gates[:, 1 * H:2 * H])
        g = jnp.tanh(gates[:, 2 * H:3 * H])
        o = jax.nn.sigmoid(gates[:, 3 * H:4 * H])
        c = f * c + i * g
        h = o * jnp.tanh(c)
        return (h, c), h

    h0 = jnp.zeros((B, H), jnp.float32)
    c0 = jnp.zeros((B, H), jnp.float32)
    _, hs = jax.lax.scan(step, (h0, c0), jnp.transpose(x, (1, 0, 2)))
    lstm_out = jnp.transpose(hs, (1, 0, 2))                        # (B, T, H)
    return lstm_out @ params["w_fc"].T + params["b_fc"]


def init_params(key, input_size, hidden_size, output_size):
    """Deterministic init matching nn.LSTM / nn.Linear shapes (num_layers=1)."""
    ks = jax.random.split(key, 6)
    bound = 1.0 / jnp.sqrt(hidden_size)
    u = lambda k, shape, b: jax.random.uniform(k, shape, jnp.float32, -b, b)
    return {
        "w_ih": u(ks[0], (4 * hidden_size, input_size), bound),
        "w_hh": u(ks[1], (4 * hidden_size, hidden_size), bound),
        "b_ih": u(ks[2], (4 * hidden_size,), bound),
        "b_hh": u(ks[3], (4 * hidden_size,), bound),
        "w_fc": u(ks[4], (output_size, hidden_size), bound),
        "b_fc": u(ks[5], (output_size,), bound),
    }


if __name__ == "__main__":
    key = jax.random.PRNGKey(0)
    k_x, k_p = jax.random.split(key)

    B, T, Hs, Ws = 2, 8, 4, 4              # 4-D input -> flattened feature 16
    input_size = Hs * Ws
    hidden_size = 32
    output_size = 5

    x = jax.random.normal(k_x, (B, T, Hs, Ws), jnp.float32)
    params = init_params(k_p, input_size, hidden_size, output_size)

    ref = _reference_forward(x, params)

    # f32 path (exact-ish vs reference); time_chunk=4 -> 2 time-chunks so the
    # cross-grid-step h/c carry is exercised.
    out = full_video_lstm_forward(x, params, time_chunk=4)
    out = jax.block_until_ready(out)
    assert out.shape == (B, T, output_size), out.shape
    assert jnp.allclose(out, ref, atol=1e-4, rtol=1e-4), "f32 mismatch vs ref"

    # bf16 matmul-operand path (v6e / v7x MXU fast path) -- looser tolerance.
    out_bf16 = full_video_lstm_forward(x, params, time_chunk=4,
                                       matmul_dtype=jnp.bfloat16)
    out_bf16 = jax.block_until_ready(out_bf16)
    assert jnp.allclose(out_bf16, ref, atol=5e-2, rtol=5e-2), "bf16 mismatch"

    # Default (larger-tile) config as well, to exercise the auto tiling path.
    out_def = full_video_lstm_forward(x, params)
    out_def = jax.block_until_ready(out_def)
    assert jnp.allclose(out_def, ref, atol=1e-4, rtol=1e-4), "default mismatch"

    print("KERNEL_OK")
</pallas_src>

<mosaic_0001>
module attributes {stable_mosaic.version = 11 : i64} {
  func.func @_lstm_recurrent_kernel(%arg0: i32, %arg1: i32, %arg2: memref<4x8x16xf32, #tpu.memory_space<vmem>>, %arg3: memref<16x128xf32, #tpu.memory_space<vmem>>, %arg4: memref<32x128xf32, #tpu.memory_space<vmem>>, %arg5: memref<1x128xf32, #tpu.memory_space<vmem>>, %arg6: memref<4x8x32xf32, #tpu.memory_space<vmem>>, %arg7: memref<8x32xf32, #tpu.memory_space<vmem>>, %arg8: memref<8x32xf32, #tpu.memory_space<vmem>>) attributes {dimension_semantics = [#tpu.dimension_semantics<parallel>, #tpu.dimension_semantics<arbitrary>], iteration_bounds = array<i64: 1, 2>, scalar_prefetch = 0 : i64, scratch_operands = 2 : i64, tpu.core_type = #tpu.core_type<tc>, window_params = [{transform_indices = @transform_0, window_bounds = array<i64: 4, 8, 16>}, {pipeline_mode = #tpu.pipeline_mode<synchronous>, transform_indices = @transform_1, window_bounds = array<i64: 16, 128>}, {pipeline_mode = #tpu.pipeline_mode<synchronous>, transform_indices = @transform_2, window_bounds = array<i64: 32, 128>}, {pipeline_mode = #tpu.pipeline_mode<synchronous>, transform_indices = @transform_3, window_bounds = array<i64: 1, 128>}, {transform_indices = @transform_4, window_bounds = array<i64: 4, 8, 32>}]} {
    %c0_i32 = arith.constant 0 : i32
    %0 = arith.cmpi eq, %arg1, %c0_i32 : i32
    %1 = arith.extui %0 : i1 to i32
    %c0_i32_0 = arith.constant 0 : i32
    %2 = arith.cmpi ne, %1, %c0_i32_0 : i32
    scf.if %2 {
      %cst_116 = arith.constant 0.000000e+00 : f32
      %203 = vector.broadcast %cst_116 : f32 to vector<8x32xf32>
      %c0_117 = arith.constant 0 : index
      %c0_118 = arith.constant 0 : index
      %204 = vector.load %arg7[%c0_117, %c0_118] : memref<8x32xf32, #tpu.memory_space<vmem>>, vector<8x32xf32>
      tpu.vector_store %arg7[%c0_117, %c0_118], %203 {strides = array<i32>} : memref<8x32xf32, #tpu.memory_space<vmem>>, vector<8x32xf32>,
      %cst_119 = arith.constant 0.000000e+00 : f32
      %205 = vector.broadcast %cst_119 : f32 to vector<8x32xf32>
      %c0_120 = arith.constant 0 : index
      %c0_121 = arith.constant 0 : index
      %206 = vector.load %arg8[%c0_120, %c0_121] : memref<8x32xf32, #tpu.memory_space<vmem>>, vector<8x32xf32>
      tpu.vector_store %arg8[%c0_120, %c0_121], %205 {strides = array<i32>} : memref<8x32xf32, #tpu.memory_space<vmem>>, vector<8x32xf32>,
    } else {
    }
    %c0_i32_1 = arith.constant 0 : i32
    %c0 = arith.constant 0 : index
    %c0_2 = arith.constant 0 : index
    %3 = vector.load %arg7[%c0, %c0_2] : memref<8x32xf32, #tpu.memory_space<vmem>>, vector<8x32xf32>
    %c0_3 = arith.constant 0 : index
    %c0_4 = arith.constant 0 : index
    %4 = vector.load %arg8[%c0_3, %c0_4] : memref<8x32xf32, #tpu.memory_space<vmem>>, vector<8x32xf32>
    %5 = arith.index_cast %c0_i32_1 : i32 to index
    %c0_5 = arith.constant 0 : index
    %c0_6 = arith.constant 0 : index
    %6 = vector.load %arg2[%5, %c0_5, %c0_6] : memref<4x8x16xf32, #tpu.memory_space<vmem>>, vector<1x8x16xf32>
    %7 = vector.shape_cast %6 : vector<1x8x16xf32> to vector<8x16xf32>
    %c0_7 = arith.constant 0 : index
    %c0_8 = arith.constant 0 : index
    %8 = vector.load %arg3[%c0_7, %c0_8] : memref<16x128xf32, #tpu.memory_space<vmem>>, vector<16x128xf32>
    %cst = arith.constant dense<0.000000e+00> : vector<8x128xf32>
    %9 = tpu.matmul %7, %8, %cst {dimension_numbers = #tpu.dot_dimension_numbers<[1], [0], [0], [1], [0, 0, 1, 1], [], []>} : vector<8x16xf32>, vector<16x128xf32>, vector<8x128xf32> -> vector<8x128xf32>
    %c0_9 = arith.constant 0 : index
    %c0_10 = arith.constant 0 : index
    %10 = vector.load %arg5[%c0_9, %c0_10] : memref<1x128xf32, #tpu.memory_space<vmem>>, vector<1x128xf32>
    %11 = vector.broadcast %10 : vector<1x128xf32> to vector<8x128xf32>
    %12 = arith.addf %9, %11 : vector<8x128xf32>
    %c0_11 = arith.constant 0 : index
    %c0_12 = arith.constant 0 : index
    %13 = vector.load %arg4[%c0_11, %c0_12] : memref<32x128xf32, #tpu.memory_space<vmem>>, vector<32x128xf32>
    %cst_13 = arith.constant dense<0.000000e+00> : vector<8x128xf32>
    %14 = tpu.matmul %3, %13, %cst_13 {dimension_numbers = #tpu.dot_dimension_numbers<[1], [0], [0], [1], [0, 0, 1, 1], [], []>} : vector<8x32xf32>, vector<32x128xf32>, vector<8x128xf32> -> vector<8x128xf32>
    %15 = arith.addf %12, %14 : vector<8x128xf32>
    %16 = vector.extract_strided_slice %15 {offsets = [0, 0], sizes = [8, 32], strides = [1, 1]} : vector<8x128xf32> to vector<8x32xf32>
    %cst_14 = arith.constant 5.000000e-01 : f32
    %17 = vector.broadcast %cst_14 : f32 to vector<8x32xf32>
    %18 = arith.mulf %17, %16 : vector<8x32xf32>
    %19 = math.tanh %18 : vector<8x32xf32>
    %cst_15 = arith.constant 5.000000e-01 : f32
    %20 = vector.broadcast %cst_15 : f32 to vector<8x32xf32>
    %21 = arith.mulf %20, %19 : vector<8x32xf32>
    %cst_16 = arith.constant 5.000000e-01 : f32
    %22 = vector.broadcast %cst_16 : f32 to vector<8x32xf32>
    %23 = arith.addf %21, %22 : vector<8x32xf32>
    %24 = vector.extract_strided_slice %15 {offsets = [0, 32], sizes = [8, 32], strides = [1, 1]} : vector<8x128xf32> to vector<8x32xf32>
    %cst_17 = arith.constant 5.000000e-01 : f32
    %25 = vector.broadcast %cst_17 : f32 to vector<8x32xf32>
    %26 = arith.mulf %25, %24 : vector<8x32xf32>
    %27 = math.tanh %26 : vector<8x32xf32>
    %cst_18 = arith.constant 5.000000e-01 : f32
    %28 = vector.broadcast %cst_18 : f32 to vector<8x32xf32>
    %29 = arith.mulf %28, %27 : vector<8x32xf32>
    %cst_19 = arith.constant 5.000000e-01 : f32
    %30 = vector.broadcast %cst_19 : f32 to vector<8x32xf32>
    %31 = arith.addf %29, %30 : vector<8x32xf32>
    %32 = vector.extract_strided_slice %15 {offsets = [0, 64], sizes = [8, 32], strides = [1, 1]} : vector<8x128xf32> to vector<8x32xf32>
    %33 = math.tanh %32 : vector<8x32xf32>
    %34 = vector.extract_strided_slice %15 {offsets = [0, 96], sizes = [8, 32], strides = [1, 1]} : vector<8x128xf32> to vector<8x32xf32>
    %cst_20 = arith.constant 5.000000e-01 : f32
    %35 = vector.broadcast %cst_20 : f32 to vector<8x32xf32>
    %36 = arith.mulf %35, %34 : vector<8x32xf32>
    %37 = math.tanh %36 : vector<8x32xf32>
    %cst_21 = arith.constant 5.000000e-01 : f32
    %38 = vector.broadcast %cst_21 : f32 to vector<8x32xf32>
    %39 = arith.mulf %38, %37 : vector<8x32xf32>
    %cst_22 = arith.constant 5.000000e-01 : f32
    %40 = vector.broadcast %cst_22 : f32 to vector<8x32xf32>
    %41 = arith.addf %39, %40 : vector<8x32xf32>
    %42 = arith.mulf %31, %4 : vector<8x32xf32>
    %43 = arith.mulf %23, %33 : vector<8x32xf32>
    %44 = arith.addf %42, %43 : vector<8x32xf32>
    %45 = math.tanh %44 : vector<8x32xf32>
    %46 = arith.mulf %41, %45 : vector<8x32xf32>
    %c0_23 = arith.constant 0 : index
    %c0_24 = arith.constant 0 : index
    %47 = vector.load %arg8[%c0_23, %c0_24] : memref<8x32xf32, #tpu.memory_space<vmem>>, vector<8x32xf32>
    tpu.vector_store %arg8[%c0_23, %c0_24], %44 {strides = array<i32>} : memref<8x32xf32, #tpu.memory_space<vmem>>, vector<8x32xf32>,
    %c0_25 = arith.constant 0 : index
    %c0_26 = arith.constant 0 : index
    %48 = vector.load %arg7[%c0_25, %c0_26] : memref<8x32xf32, #tpu.memory_space<vmem>>, vector<8x32xf32>
    tpu.vector_store %arg7[%c0_25, %c0_26], %46 {strides = array<i32>} : memref<8x32xf32, #tpu.memory_space<vmem>>, vector<8x32xf32>,
    %49 = arith.index_cast %c0_i32_1 : i32 to index
    %c0_27 = arith.constant 0 : index
    %c0_28 = arith.constant 0 : index
    %50 = vector.load %arg6[%49, %c0_27, %c0_28] : memref<4x8x32xf32, #tpu.memory_space<vmem>>, vector<1x8x32xf32>
    %51 = vector.shape_cast %50 : vector<1x8x32xf32> to vector<8x32xf32>
    %52 = vector.shape_cast %46 : vector<8x32xf32> to vector<1x8x32xf32>
    tpu.vector_store %arg6[%49, %c0_27, %c0_28], %52 {strides = array<i32>} : memref<4x8x32xf32, #tpu.memory_space<vmem>>, vector<1x8x32xf32>,
    %c1_i32 = arith.constant 1 : i32
    %c0_29 = arith.constant 0 : index
    %c0_30 = arith.constant 0 : index
    %53 = vector.load %arg7[%c0_29, %c0_30] : memref<8x32xf32, #tpu.memory_space<vmem>>, vector<8x32xf32>
    %c0_31 = arith.constant 0 : index
    %c0_32 = arith.constant 0 : index
    %54 = vector.load %arg8[%c0_31, %c0_32] : memref<8x32xf32, #tpu.memory_space<vmem>>, vector<8x32xf32>
    %55 = arith.index_cast %c1_i32 : i32 to index
    %c0_33 = arith.constant 0 : index
    %c0_34 = arith.constant 0 : index
    %56 = vector.load %arg2[%55, %c0_33, %c0_34] : memref<4x8x16xf32, #tpu.memory_space<vmem>>, vector<1x8x16xf32>
    %57 = vector.shape_cast %56 : vector<1x8x16xf32> to vector<8x16xf32>
    %c0_35 = arith.constant 0 : index
    %c0_36 = arith.constant 0 : index
    %58 = vector.load %arg3[%c0_35, %c0_36] : memref<16x128xf32, #tpu.memory_space<vmem>>, vector<16x128xf32>
    %cst_37 = arith.constant dense<0.000000e+00> : vector<8x128xf32>
    %59 = tpu.matmul %57, %58, %cst_37 {dimension_numbers = #tpu.dot_dimension_numbers<[1], [0], [0], [1], [0, 0, 1, 1], [], []>} : vector<8x16xf32>, vector<16x128xf32>, vector<8x128xf32> -> vector<8x128xf32>
    %c0_38 = arith.constant 0 : index
    %c0_39 = arith.constant 0 : index
    %60 = vector.load %arg5[%c0_38, %c0_39] : memref<1x128xf32, #tpu.memory_space<vmem>>, vector<1x128xf32>
    %61 = vector.broadcast %60 : vector<1x128xf32> to vector<8x128xf32>
    %62 = arith.addf %59, %61 : vector<8x128xf32>
    %c0_40 = arith.constant 0 : index
    %c0_41 = arith.constant 0 : index
    %63 = vector.load %arg4[%c0_40, %c0_41] : memref<32x128xf32, #tpu.memory_space<vmem>>, vector<32x128xf32>
    %cst_42 = arith.constant dense<0.000000e+00> : vector<8x128xf32>
    %64 = tpu.matmul %53, %63, %cst_42 {dimension_numbers = #tpu.dot_dimension_numbers<[1], [0], [0], [1], [0, 0, 1, 1], [], []>} : vector<8x32xf32>, vector<32x128xf32>, vector<8x128xf32> -> vector<8x128xf32>
    %65 = arith.addf %62, %64 : vector<8x128xf32>
    %66 = vector.extract_strided_slice %65 {offsets = [0, 0], sizes = [8, 32], strides = [1, 1]} : vector<8x128xf32> to vector<8x32xf32>
    %cst_43 = arith.constant 5.000000e-01 : f32
    %67 = vector.broadcast %cst_43 : f32 to vector<8x32xf32>
    %68 = arith.mulf %67, %66 : vector<8x32xf32>
    %69 = math.tanh %68 : vector<8x32xf32>
    %cst_44 = arith.constant 5.000000e-01 : f32
    %70 = vector.broadcast %cst_44 : f32 to vector<8x32xf32>
    %71 = arith.mulf %70, %69 : vector<8x32xf32>
    %cst_45 = arith.constant 5.000000e-01 : f32
    %72 = vector.broadcast %cst_45 : f32 to vector<8x32xf32>
    %73 = arith.addf %71, %72 : vector<8x32xf32>
    %74 = vector.extract_strided_slice %65 {offsets = [0, 32], sizes = [8, 32], strides = [1, 1]} : vector<8x128xf32> to vector<8x32xf32>
    %cst_46 = arith.constant 5.000000e-01 : f32
    %75 = vector.broadcast %cst_46 : f32 to vector<8x32xf32>
    %76 = arith.mulf %75, %74 : vector<8x32xf32>
    %77 = math.tanh %76 : vector<8x32xf32>
    %cst_47 = arith.constant 5.000000e-01 : f32
    %78 = vector.broadcast %cst_47 : f32 to vector<8x32xf32>
    %79 = arith.mulf %78, %77 : vector<8x32xf32>
    %cst_48 = arith.constant 5.000000e-01 : f32
    %80 = vector.broadcast %cst_48 : f32 to vector<8x32xf32>
    %81 = arith.addf %79, %80 : vector<8x32xf32>
    %82 = vector.extract_strided_slice %65 {offsets = [0, 64], sizes = [8, 32], strides = [1, 1]} : vector<8x128xf32> to vector<8x32xf32>
    %83 = math.tanh %82 : vector<8x32xf32>
    %84 = vector.extract_strided_slice %65 {offsets = [0, 96], sizes = [8, 32], strides = [1, 1]} : vector<8x128xf32> to vector<8x32xf32>
    %cst_49 = arith.constant 5.000000e-01 : f32
    %85 = vector.broadcast %cst_49 : f32 to vector<8x32xf32>
    %86 = arith.mulf %85, %84 : vector<8x32xf32>
    %87 = math.tanh %86 : vector<8x32xf32>
    %cst_50 = arith.constant 5.000000e-01 : f32
    %88 = vector.broadcast %cst_50 : f32 to vector<8x32xf32>
    %89 = arith.mulf %88, %87 : vector<8x32xf32>
    %cst_51 = arith.constant 5.000000e-01 : f32
    %90 = vector.broadcast %cst_51 : f32 to vector<8x32xf32>
    %91 = arith.addf %89, %90 : vector<8x32xf32>
    %92 = arith.mulf %81, %54 : vector<8x32xf32>
    %93 = arith.mulf %73, %83 : vector<8x32xf32>
    %94 = arith.addf %92, %93 : vector<8x32xf32>
    %95 = math.tanh %94 : vector<8x32xf32>
    %96 = arith.mulf %91, %95 : vector<8x32xf32>
    %c0_52 = arith.constant 0 : index
    %c0_53 = arith.constant 0 : index
    %97 = vector.load %arg8[%c0_52, %c0_53] : memref<8x32xf32, #tpu.memory_space<vmem>>, vector<8x32xf32>
    tpu.vector_store %arg8[%c0_52, %c0_53], %94 {strides = array<i32>} : memref<8x32xf32, #tpu.memory_space<vmem>>, vector<8x32xf32>,
    %c0_54 = arith.constant 0 : index
    %c0_55 = arith.constant 0 : index
    %98 = vector.load %arg7[%c0_54, %c0_55] : memref<8x32xf32, #tpu.memory_space<vmem>>, vector<8x32xf32>
    tpu.vector_store %arg7[%c0_54, %c0_55], %96 {strides = array<i32>} : memref<8x32xf32, #tpu.memory_space<vmem>>, vector<8x32xf32>,
    %99 = arith.index_cast %c1_i32 : i32 to index
    %c0_56 = arith.constant 0 : index
    %c0_57 = arith.constant 0 : index
    %100 = vector.load %arg6[%99, %c0_56, %c0_57] : memref<4x8x32xf32, #tpu.memory_space<vmem>>, vector<1x8x32xf32>
    %101 = vector.shape_cast %100 : vector<1x8x32xf32> to vector<8x32xf32>
    %102 = vector.shape_cast %96 : vector<8x32xf32> to vector<1x8x32xf32>
    tpu.vector_store %arg6[%99, %c0_56, %c0_57], %102 {strides = array<i32>} : memref<4x8x32xf32, #tpu.memory_space<vmem>>, vector<1x8x32xf32>,
    %c2_i32 = arith.constant 2 : i32
    %c0_58 = arith.constant 0 : index
    %c0_59 = arith.constant 0 : index
    %103 = vector.load %arg7[%c0_58, %c0_59] : memref<8x32xf32, #tpu.memory_space<vmem>>, vector<8x32xf32>
    %c0_60 = arith.constant 0 : index
    %c0_61 = arith.constant 0 : index
    %104 = vector.load %arg8[%c0_60, %c0_61] : memref<8x32xf32, #tpu.memory_space<vmem>>, vector<8x32xf32>
    %105 = arith.index_cast %c2_i32 : i32 to index
    %c0_62 = arith.constant 0 : index
    %c0_63 = arith.constant 0 : index
    %106 = vector.load %arg2[%105, %c0_62, %c0_63] : memref<4x8x16xf32, #tpu.memory_space<vmem>>, vector<1x8x16xf32>
    %107 = vector.shape_cast %106 : vector<1x8x16xf32> to vector<8x16xf32>
    %c0_64 = arith.constant 0 : index
    %c0_65 = arith.constant 0 : index
    %108 = vector.load %arg3[%c0_64, %c0_65] : memref<16x128xf32, #tpu.memory_space<vmem>>, vector<16x128xf32>
    %cst_66 = arith.constant dense<0.000000e+00> : vector<8x128xf32>
    %109 = tpu.matmul %107, %108, %cst_66 {dimension_numbers = #tpu.dot_dimension_numbers<[1], [0], [0], [1], [0, 0, 1, 1], [], []>} : vector<8x16xf32>, vector<16x128xf32>, vector<8x128xf32> -> vector<8x128xf32>
    %c0_67 = arith.constant 0 : index
    %c0_68 = arith.constant 0 : index
    %110 = vector.load %arg5[%c0_67, %c0_68] : memref<1x128xf32, #tpu.memory_space<vmem>>, vector<1x128xf32>
    %111 = vector.broadcast %110 : vector<1x128xf32> to vector<8x128xf32>
    %112 = arith.addf %109, %111 : vector<8x128xf32>
    %c0_69 = arith.constant 0 : index
    %c0_70 = arith.constant 0 : index
    %113 = vector.load %arg4[%c0_69, %c0_70] : memref<32x128xf32, #tpu.memory_space<vmem>>, vector<32x128xf32>
    %cst_71 = arith.constant dense<0.000000e+00> : vector<8x128xf32>
    %114 = tpu.matmul %103, %113, %cst_71 {dimension_numbers = #tpu.dot_dimension_numbers<[1], [0], [0], [1], [0, 0, 1, 1], [], []>} : vector<8x32xf32>, vector<32x128xf32>, vector<8x128xf32> -> vector<8x128xf32>
    %115 = arith.addf %112, %114 : vector<8x128xf32>
    %116 = vector.extract_strided_slice %115 {offsets = [0, 0], sizes = [8, 32], strides = [1, 1]} : vector<8x128xf32> to vector<8x32xf32>
    %cst_72 = arith.constant 5.000000e-01 : f32
    %117 = vector.broadcast %cst_72 : f32 to vector<8x32xf32>
    %118 = arith.mulf %117, %116 : vector<8x32xf32>
    %119 = math.tanh %118 : vector<8x32xf32>
    %cst_73 = arith.constant 5.000000e-01 : f32
    %120 = vector.broadcast %cst_73 : f32 to vector<8x32xf32>
    %121 = arith.mulf %120, %119 : vector<8x32xf32>
    %cst_74 = arith.constant 5.000000e-01 : f32
    %122 = vector.broadcast %cst_74 : f32 to vector<8x32xf32>
    %123 = arith.addf %121, %122 : vector<8x32xf32>
    %124 = vector.extract_strided_slice %115 {offsets = [0, 32], sizes = [8, 32], strides = [1, 1]} : vector<8x128xf32> to vector<8x32xf32>
    %cst_75 = arith.constant 5.000000e-01 : f32
    %125 = vector.broadcast %cst_75 : f32 to vector<8x32xf32>
    %126 = arith.mulf %125, %124 : vector<8x32xf32>
    %127 = math.tanh %126 : vector<8x32xf32>
    %cst_76 = arith.constant 5.000000e-01 : f32
    %128 = vector.broadcast %cst_76 : f32 to vector<8x32xf32>
    %129 = arith.mulf %128, %127 : vector<8x32xf32>
    %cst_77 = arith.constant 5.000000e-01 : f32
    %130 = vector.broadcast %cst_77 : f32 to vector<8x32xf32>
    %131 = arith.addf %129, %130 : vector<8x32xf32>
    %132 = vector.extract_strided_slice %115 {offsets = [0, 64], sizes = [8, 32], strides = [1, 1]} : vector<8x128xf32> to vector<8x32xf32>
    %133 = math.tanh %132 : vector<8x32xf32>
    %134 = vector.extract_strided_slice %115 {offsets = [0, 96], sizes = [8, 32], strides = [1, 1]} : vector<8x128xf32> to vector<8x32xf32>
    %cst_78 = arith.constant 5.000000e-01 : f32
    %135 = vector.broadcast %cst_78 : f32 to vector<8x32xf32>
    %136 = arith.mulf %135, %134 : vector<8x32xf32>
    %137 = math.tanh %136 : vector<8x32xf32>
    %cst_79 = arith.constant 5.000000e-01 : f32
    %138 = vector.broadcast %cst_79 : f32 to vector<8x32xf32>
    %139 = arith.mulf %138, %137 : vector<8x32xf32>
    %cst_80 = arith.constant 5.000000e-01 : f32
    %140 = vector.broadcast %cst_80 : f32 to vector<8x32xf32>
    %141 = arith.addf %139, %140 : vector<8x32xf32>
    %142 = arith.mulf %131, %104 : vector<8x32xf32>
    %143 = arith.mulf %123, %133 : vector<8x32xf32>
    %144 = arith.addf %142, %143 : vector<8x32xf32>
    %145 = math.tanh %144 : vector<8x32xf32>
    %146 = arith.mulf %141, %145 : vector<8x32xf32>
    %c0_81 = arith.constant 0 : index
    %c0_82 = arith.constant 0 : index
    %147 = vector.load %arg8[%c0_81, %c0_82] : memref<8x32xf32, #tpu.memory_space<vmem>>, vector<8x32xf32>
    tpu.vector_store %arg8[%c0_81, %c0_82], %144 {strides = array<i32>} : memref<8x32xf32, #tpu.memory_space<vmem>>, vector<8x32xf32>,
    %c0_83 = arith.constant 0 : index
    %c0_84 = arith.constant 0 : index
    %148 = vector.load %arg7[%c0_83, %c0_84] : memref<8x32xf32, #tpu.memory_space<vmem>>, vector<8x32xf32>
    tpu.vector_store %arg7[%c0_83, %c0_84], %146 {strides = array<i32>} : memref<8x32xf32, #tpu.memory_space<vmem>>, vector<8x32xf32>,
    %149 = arith.index_cast %c2_i32 : i32 to index
    %c0_85 = arith.constant 0 : index
    %c0_86 = arith.constant 0 : index
    %150 = vector.load %arg6[%149, %c0_85, %c0_86] : memref<4x8x32xf32, #tpu.memory_space<vmem>>, vector<1x8x32xf32>
    %151 = vector.shape_cast %150 : vector<1x8x32xf32> to vector<8x32xf32>
    %152 = vector.shape_cast %146 : vector<8x32xf32> to vector<1x8x32xf32>
    tpu.vector_store %arg6[%149, %c0_85, %c0_86], %152 {strides = array<i32>} : memref<4x8x32xf32, #tpu.memory_space<vmem>>, vector<1x8x32xf32>,
    %c3_i32 = arith.constant 3 : i32
    %c0_87 = arith.constant 0 : index
    %c0_88 = arith.constant 0 : index
    %153 = vector.load %arg7[%c0_87, %c0_88] : memref<8x32xf32, #tpu.memory_space<vmem>>, vector<8x32xf32>
    %c0_89 = arith.constant 0 : index
    %c0_90 = arith.constant 0 : index
    %154 = vector.load %arg8[%c0_89, %c0_90] : memref<8x32xf32, #tpu.memory_space<vmem>>, vector<8x32xf32>
    %155 = arith.index_cast %c3_i32 : i32 to index
    %c0_91 = arith.constant 0 : index
    %c0_92 = arith.constant 0 : index
    %156 = vector.load %arg2[%155, %c0_91, %c0_92] : memref<4x8x16xf32, #tpu.memory_space<vmem>>, vector<1x8x16xf32>
    %157 = vector.shape_cast %156 : vector<1x8x16xf32> to vector<8x16xf32>
    %c0_93 = arith.constant 0 : index
    %c0_94 = arith.constant 0 : index
    %158 = vector.load %arg3[%c0_93, %c0_94] : memref<16x128xf32, #tpu.memory_space<vmem>>, vector<16x128xf32>
    %cst_95 = arith.constant dense<0.000000e+00> : vector<8x128xf32>
    %159 = tpu.matmul %157, %158, %cst_95 {dimension_numbers = #tpu.dot_dimension_numbers<[1], [0], [0], [1], [0, 0, 1, 1], [], []>} : vector<8x16xf32>, vector<16x128xf32>, vector<8x128xf32> -> vector<8x128xf32>
    %c0_96 = arith.constant 0 : index
    %c0_97 = arith.constant 0 : index
    %160 = vector.load %arg5[%c0_96, %c0_97] : memref<1x128xf32, #tpu.memory_space<vmem>>, vector<1x128xf32>
    %161 = vector.broadcast %160 : vector<1x128xf32> to vector<8x128xf32>
    %162 = arith.addf %159, %161 : vector<8x128xf32>
    %c0_98 = arith.constant 0 : index
    %c0_99 = arith.constant 0 : index
    %163 = vector.load %arg4[%c0_98, %c0_99] : memref<32x128xf32, #tpu.memory_space<vmem>>, vector<32x128xf32>
    %cst_100 = arith.constant dense<0.000000e+00> : vector<8x128xf32>
    %164 = tpu.matmul %153, %163, %cst_100 {dimension_numbers = #tpu.dot_dimension_numbers<[1], [0], [0], [1], [0, 0, 1, 1], [], []>} : vector<8x32xf32>, vector<32x128xf32>, vector<8x128xf32> -> vector<8x128xf32>
    %165 = arith.addf %162, %164 : vector<8x128xf32>
    %166 = vector.extract_strided_slice %165 {offsets = [0, 0], sizes = [8, 32], strides = [1, 1]} : vector<8x128xf32> to vector<8x32xf32>
    %cst_101 = arith.constant 5.000000e-01 : f32
    %167 = vector.broadcast %cst_101 : f32 to vector<8x32xf32>
    %168 = arith.mulf %167, %166 : vector<8x32xf32>
    %169 = math.tanh %168 : vector<8x32xf32>
    %cst_102 = arith.constant 5.000000e-01 : f32
    %170 = vector.broadcast %cst_102 : f32 to vector<8x32xf32>
    %171 = arith.mulf %170, %169 : vector<8x32xf32>
    %cst_103 = arith.constant 5.000000e-01 : f32
    %172 = vector.broadcast %cst_103 : f32 to vector<8x32xf32>
    %173 = arith.addf %171, %172 : vector<8x32xf32>
    %174 = vector.extract_strided_slice %165 {offsets = [0, 32], sizes = [8, 32], strides = [1, 1]} : vector<8x128xf32> to vector<8x32xf32>
    %cst_104 = arith.constant 5.000000e-01 : f32
    %175 = vector.broadcast %cst_104 : f32 to vector<8x32xf32>
    %176 = arith.mulf %175, %174 : vector<8x32xf32>
    %177 = math.tanh %176 : vector<8x32xf32>
    %cst_105 = arith.constant 5.000000e-01 : f32
    %178 = vector.broadcast %cst_105 : f32 to vector<8x32xf32>
    %179 = arith.mulf %178, %177 : vector<8x32xf32>
    %cst_106 = arith.constant 5.000000e-01 : f32
    %180 = vector.broadcast %cst_106 : f32 to vector<8x32xf32>
    %181 = arith.addf %179, %180 : vector<8x32xf32>
    %182 = vector.extract_strided_slice %165 {offsets = [0, 64], sizes = [8, 32], strides = [1, 1]} : vector<8x128xf32> to vector<8x32xf32>
    %183 = math.tanh %182 : vector<8x32xf32>
    %184 = vector.extract_strided_slice %165 {offsets = [0, 96], sizes = [8, 32], strides = [1, 1]} : vector<8x128xf32> to vector<8x32xf32>
    %cst_107 = arith.constant 5.000000e-01 : f32
    %185 = vector.broadcast %cst_107 : f32 to vector<8x32xf32>
    %186 = arith.mulf %185, %184 : vector<8x32xf32>
    %187 = math.tanh %186 : vector<8x32xf32>
    %cst_108 = arith.constant 5.000000e-01 : f32
    %188 = vector.broadcast %cst_108 : f32 to vector<8x32xf32>
    %189 = arith.mulf %188, %187 : vector<8x32xf32>
    %cst_109 = arith.constant 5.000000e-01 : f32
    %190 = vector.broadcast %cst_109 : f32 to vector<8x32xf32>
    %191 = arith.addf %189, %190 : vector<8x32xf32>
    %192 = arith.mulf %181, %154 : vector<8x32xf32>
    %193 = arith.mulf %173, %183 : vector<8x32xf32>
    %194 = arith.addf %192, %193 : vector<8x32xf32>
    %195 = math.tanh %194 : vector<8x32xf32>
    %196 = arith.mulf %191, %195 : vector<8x32xf32>
    %c0_110 = arith.constant 0 : index
    %c0_111 = arith.constant 0 : index
    %197 = vector.load %arg8[%c0_110, %c0_111] : memref<8x32xf32, #tpu.memory_space<vmem>>, vector<8x32xf32>
    tpu.vector_store %arg8[%c0_110, %c0_111], %194 {strides = array<i32>} : memref<8x32xf32, #tpu.memory_space<vmem>>, vector<8x32xf32>,
    %c0_112 = arith.constant 0 : index
    %c0_113 = arith.constant 0 : index
    %198 = vector.load %arg7[%c0_112, %c0_113] : memref<8x32xf32, #tpu.memory_space<vmem>>, vector<8x32xf32>
    tpu.vector_store %arg7[%c0_112, %c0_113], %196 {strides = array<i32>} : memref<8x32xf32, #tpu.memory_space<vmem>>, vector<8x32xf32>,
    %199 = arith.index_cast %c3_i32 : i32 to index
    %c0_114 = arith.constant 0 : index
    %c0_115 = arith.constant 0 : index
    %200 = vector.load %arg6[%199, %c0_114, %c0_115] : memref<4x8x32xf32, #tpu.memory_space<vmem>>, vector<1x8x32xf32>
    %201 = vector.shape_cast %200 : vector<1x8x32xf32> to vector<8x32xf32>
    %202 = vector.shape_cast %196 : vector<8x32xf32> to vector<1x8x32xf32>
    tpu.vector_store %arg6[%199, %c0_114, %c0_115], %202 {strides = array<i32>} : memref<4x8x32xf32, #tpu.memory_space<vmem>>, vector<1x8x32xf32>,
    %c4_i32 = arith.constant 4 : i32
    return
  }
  func.func @transform_0(%arg0: i32, %arg1: i32) -> (i32, i32, i32) {
    %c0_i32 = arith.constant 0 : i32
    %c0_i32_0 = arith.constant 0 : i32
    return %arg1, %arg0, %c0_i32 : i32, i32, i32
  }
  func.func @transform_1(%arg0: i32, %arg1: i32) -> (i32, i32) {
    %c0_i32 = arith.constant 0 : i32
    %c0_i32_0 = arith.constant 0 : i32
    %c0_i32_1 = arith.constant 0 : i32
    return %c0_i32, %c0_i32_0 : i32, i32
  }
  func.func @transform_2(%arg0: i32, %arg1: i32) -> (i32, i32) {
    %c0_i32 = arith.constant 0 : i32
    %c0_i32_0 = arith.constant 0 : i32
    %c0_i32_1 = arith.constant 0 : i32
    return %c0_i32, %c0_i32_0 : i32, i32
  }
  func.func @transform_3(%arg0: i32, %arg1: i32) -> (i32, i32) {
    %c0_i32 = arith.constant 0 : i32
    %c0_i32_0 = arith.constant 0 : i32
    %c0_i32_1 = arith.constant 0 : i32
    return %c0_i32, %c0_i32_0 : i32, i32
  }
  func.func @transform_4(%arg0: i32, %arg1: i32) -> (i32, i32, i32) {
    %c0_i32 = arith.constant 0 : i32
    %c0_i32_0 = arith.constant 0 : i32
    return %arg1, %arg0, %c0_i32 : i32, i32, i32
  }
}

</mosaic_0001>

<bundles_post_ra>
// kernel: tpu_custom_call.1
= control target key start
LH: loop header
LB: loop body
LE: loop exit
PB: predicated region body
PF: predicated region fallthrough
CT: control target
= control target key end

     0   :  { %9 = vsyncpa [#allocation5], 0  ;;  %s2099_s0 = inlined_call_operand.hbm [shape: f32[8,8,16], index: 0, kind: input, shape index: {}]   ;;  %s2100_s1 = inlined_call_operand.hbm [shape: f32[16,128], index: 1, kind: input, shape index: {}]   ;;  %s2101_s2 = inlined_call_operand.hbm [shape: f32[32,128], index: 2, kind: input, shape index: {}]   ;;  %s2102_s3 = inlined_call_operand.vmem [shape: f32[1,128], index: 3, kind: input, shape index: {}]   ;;  %s2103_s4 = inlined_call_operand.hbm [shape: f32[8,8,32], index: 4, kind: output, shape index: {}]  }
   0x1   :  { %11 = vsyncpa [#allocation5 + $0x1], 0 }
   0x2   :  { %12 = vsyncpa [#allocation8], 0 }
   0x3   :  { %13 = vsyncpa [#allocation6], 0 }
   0x4   :  { %15 = vsyncpa [#allocation6 + $0x1], 0  ;;  %s1722_s15 = smov 0   ;;  %s1724_s16 = smov 0  }
   0x5   :  { %s1726_s17 = smov 0   ;;  %s1728_s18 = smov 0  }
   0x6   :  { %s1730_s19 = smov 0   ;;  %s1732_s20 = smov 0  }
   0x7 LB: > { %s1198_s21 = sadd.s32 4294967295, %s1680_s20   ;;  %s1199_s22 = sadd.s32 4294967294, %s1680_s20   ;;  %s1680_s20 = sphi %s1732_s20, %s21_s20   ;;  %s1676_s19 = sphi %s1730_s19, %s2125_s19   ;;  %s1672_s18 = sphi %s1728_s18, %s2124_s18   ;;  %s1668_s17 = sphi %s1726_s17, %s2123_s17   ;;  %s1664_s16 = sphi %s1724_s16, %s2122_s16   ;;  %s1660_s15 = sphi %s1722_s15, %s2121_s15  }
   0x8   : > { %p55_p0 = scmp.ne.s32.totalorder %s1664_s16, %s1660_s15  ;;  %p1756_p1 = scmp.eq.s32.totalorder %s1198_s21, 0 }
   0x9   : > { %p1760_p2 = scmp.eq.s32.totalorder %s1198_s21, 1  ;;  %p150_p3 = scmp.eq.s32.totalorder %s1199_s22, 1 }
   0xa   : > { %s2108_s23 = scalar_select %p1756_p1, 1, 0 }
   0xb   : > { %p1766_p4 = por %p1756_p1, %p55_p0  ;;  %p1200_p5 = scmp.ge.s32.totalorder %s1680_s20, 1 }
   0xc   : > { %p1771_p6 = por %p150_p3, %p55_p0  ;;  %p157_p7 = scmp.lt.s32.totalorder %s1680_s20, 3 }
   0xd   : > { %s2110_s25 = scalar_select %p1766_p4, 1, 0 }
   0xe   : > { %s2111_s26 = scalar_select %p1771_p6, 1, 0 }
   0xf   : > { %p1776_p8 = pnand %p1200_p5, %p157_p7  ;;  %s1682_s28 = smov [#allocation7]  }
  0x10   : > { %s169_s29 = sshll.u32 %s1682_s28, 4  ;;  %s1683_s5 = smov [#allocation9]   ;;  %s1780_s29 = int_to_ptr.vmem [resolvable:$true] %s169_s29 }
  0x11   : > { %p1402_p9 = pneg %p1776_p8  ;;  %s182_s6 = sshll.u32 %s1683_s5, 4  ;;  %s1791_s6 = int_to_ptr.vmem [resolvable:$true] %s182_s6 }
  0x12   : > { %s1508_s9 = scalar_lea.hbm %s2100_s1, 256 }
  0x13   : > { %p1787_p11 = pnand %p1402_p9, %p1756_p1  ;;  %p1509_p12 = scmp.ne.s32.totalorder %s2100_s1, %s1508_s9 }
  0x14   : > { %p1515_p5 = scmp.lt.u32.totalorder %s1508_s9, %s2100_s1 }
  0x15   : > { %p1510_p13 = pneg %p1787_p11 }
  0x17   : > { %p1511_p0 = pnand %p1510_p13, %p1509_p12 }
  0x19   : > { %p1512_p3 = pneg %p1511_p0 }
  0x1b   : > { %p1517_p7 = pnand %p1515_p5, %p1512_p3 }
  0x1d   : > { %1520 = shalt.err (!%p1517_p7)
}
  0x1e   : > { %s1521_s14 = scalar_lea.vmem %s1780_s29, 256  ;;  %p1529_p1 = scmp.lt.s32.totalorder %s1780_s29, %s1780_s29 }
  0x1f   : > { %p1522_p9 = scmp.ne.s32.totalorder %s1780_s29, %s1521_s14  ;;  %p1530_p12 = scmp.lt.s32.totalorder %s1521_s14, %s1521_s14 }
  0x21   : > { %p1524_p10 = pnand %p1522_p9, %p1510_p13  ;;  %p1531_p0 = por %p1530_p12, %p1529_p1 }
  0x23   : > { %p1525_p6 = pneg %p1524_p10 }
  0x25   : > { %p1532_p4 = pnand %p1531_p0, %p1525_p6 }
  0x27   : > { %1535 = shalt.err (!%p1532_p4)
}
  0x28   : > { %s1684_s21 = smov 128   ;;  %s1685_s22 = smov 8  }
  0x29   : > { %1405 = dma.hbm_to_vmem [thread:$0]  (!%p1787_p11), %s2100_s1, 256, %s1780_s29, [#allocation8], %s1684_s21, %s1684_s21, %s1685_s22  }
  0x2a   : > { %s1536_s9 = scalar_lea.hbm %s2101_s2, 512 }
  0x2b   : > { %p1537_p1 = scmp.ne.s32.totalorder %s2101_s2, %s1536_s9  ;;  %p1543_p10 = scmp.lt.u32.totalorder %s1536_s9, %s2101_s2 }
  0x2d   : > { %p1539_p4 = pnand %p1537_p1, %p1510_p13 }
  0x2f   : > { %p1540_p6 = pneg %p1539_p4 }
  0x31   : > { %p1545_p3 = pnand %p1543_p10, %p1540_p6 }
  0x33   : > { %1548 = shalt.err (!%p1545_p3)
}
  0x34   : > { %s1549_s29 = scalar_lea.vmem %s1791_s6, 512  ;;  %p1557_p12 = scmp.lt.s32.totalorder %s1791_s6, %s1791_s6 }
  0x35   : > { %p1550_p5 = scmp.ne.s32.totalorder %s1791_s6, %s1549_s29  ;;  %p1558_p0 = scmp.lt.s32.totalorder %s1549_s29, %s1549_s29 }
  0x37   : > { %p1552_p7 = pnand %p1550_p5, %p1510_p13  ;;  %p1559_p1 = por %p1558_p0, %p1557_p12 }
  0x39   : > { %p1553_p9 = pneg %p1552_p7 }
  0x3b   : > { %p1560_p4 = pnand %p1559_p1, %p1553_p9 }
  0x3d   : > { %1563 = shalt.err (!%p1560_p4)
}
  0x3e   : > { %1408 = dma.hbm_to_vmem [thread:$0]  (!%p1787_p11), %s2101_s2, 512, %s1791_s6, [#allocation8], %s1684_s21, %s1684_s21, %s1685_s22  }
  0x3f   : > { %s30_s30 = sadd.s32 1, %s1676_s19  ;;  %s42_s5 = sadd.s32 1, %s1668_s17 }
  0x40   : > { %p31_p13 = scmp.ge.s32.totalorder %s30_s30, 2  ;;  %p49_p6 = scmp.ne.s32.totalorder %s1668_s17, %s1664_s16 }
  0x41   : > { %p50_p10 = scmp.eq.s32.totalorder %s1680_s20, 0  ;;  %p1419_p3 = scmp.lt.s32.totalorder %s1680_s20, 2 }
  0x42   : > { %s2127_s30 = smov (%p31_p13, %s30_s30), 0  ;;  %p1861_p7 = por %p1760_p2, %p49_p6 }
  0x43   : > { %p51_p5 = por %p50_p10, %p49_p6  ;;  %s37_s8 = ssub.s32 %s1676_s19, %s2127_s30 }
  0x44   : > { %s2114_s7 = scalar_select %p1861_p7, 1, 0 }
  0x45   : > { %s199_s9 = sand.u32 1, %s1668_s17   ;;  %p40_p9 = scmp.eq.s32.totalorder %s37_s8, 0 }
  0x46   : > { %s1204_s6 = sshll.u32 %s199_s9, 5  ;;  %s1236_s10 = sshll.u32 %s1676_s19, 9 }
  0x47   : > { %s1870_s11 = scalar_select %p40_p9, %s1668_s17, %s42_s5  }
  0x48   : > { %s1875_s29 = scalar_lea.hbm %s2099_s0, %s1236_s10  ;;  %s203_s24 = scalar_lea.vmem [#allocation4], %s1204_s6 }
  0x49   : > { %s211_s14 = sshll.u32 %s203_s24, 4  ;;  %p1879_p2 = pnand %p1419_p3, %p51_p5  ;;  %s1883_s14 = int_to_ptr.vmem [resolvable:$true] %s211_s14 }
  0x4a   : > { %s1885_s5 = scalar_lea.sflag [#allocation5], %s199_s9  ;;  %s1564_s8 = scalar_lea.hbm %s1875_s29, 512 }
  0x4b   : > { %p1565_p11 = scmp.ne.s32.totalorder %s1875_s29, %s1564_s8  ;;  %p1566_p12 = pneg %p1879_p2 }
  0x4c   : > { %s1569_s12 = scalar_lea.hbm %s2099_s0, 1024  ;;  %p1570_p4 = scmp.lt.u32.totalorder %s1875_s29, %s2099_s0 }
  0x4d   : > { %p1567_p0 = pnand %p1566_p12, %p1565_p11  ;;  %p1571_p13 = scmp.lt.u32.totalorder %s1569_s12, %s1564_s8 }
  0x4e   : > { %p1573_p10 = scmp.lt.u32.totalorder %s1564_s8, %s1875_s29 }
  0x4f   : > { %p1568_p1 = pneg %p1567_p0  ;;  %p1572_p6 = por %p1571_p13, %p1570_p4 }
  0x51   : > { %p1574_p3 = por %p1573_p10, %p1572_p6 }
  0x53   : > { %p1575_p5 = pnand %p1574_p3, %p1568_p1 }
  0x55   : > { %1578 = shalt.err (!%p1575_p5)
}
  0x56   : > { %s1579_s9 = scalar_lea.vmem %s1883_s14, 512  ;;  %s1686_s6 = smov [#allocation4]  }
  0x57   : > { %p1580_p9 = scmp.ne.s32.totalorder %s1883_s14, %s1579_s9  ;;  %s1584_s10 = sshll.u32 %s1686_s6, 4  ;;  %s1585_s10 = int_to_ptr.vmem [resolvable:$false] %s1584_s10 }
  0x58   : > { %s1586_s13 = scalar_lea.vmem %s1585_s10, 1024  ;;  %p1587_p7 = scmp.lt.s32.totalorder %s1883_s14, %s1585_s10 }
  0x59   : > { %p1582_p11 = pnand %p1580_p9, %p1566_p12  ;;  %p1588_p4 = scmp.lt.s32.totalorder %s1586_s13, %s1579_s9 }
  0x5b   : > { %p1583_p0 = pneg %p1582_p11  ;;  %p1589_p13 = por %p1588_p4, %p1587_p7 }
  0x5d   : > { %p1590_p6 = pnand %p1589_p13, %p1583_p0 }
  0x5f   : > { %1593 = shalt.err (!%p1590_p6)
}
  0x60   : > { %1412 = dma.hbm_to_vmem [thread:$0]  (!%p1879_p2), %s1875_s29, 512, %s1883_s14, %s1885_s5, %s1684_s21, %s1684_s21, %s1685_s22  }
  0x61   : > { %223 = sbr.rel (%p1776_p8) target bundleno = 2978 (0xba2), region = 36  ;;  %s1919_s8 = sand.u32 (!%p1776_p8), 1, %s1664_s16  }
  0x62   : > { %s1208_s12 = sshll.u32 (!%p1776_p8), %s1919_s8, 5  ;;  %s226_s24 = scalar_lea.sflag (!%p1776_p8), [#allocation5], %s1919_s8 }
  0x63   : > { %s1923_s9 = scalar_lea.vmem (!%p1776_p8), [#allocation4], %s1208_s12  ;;  %p2116_p7 = scmp.ne.s32.totalorder (!%p1776_p8), %s2110_s25, 0 }
  0x68   : > { %1647 = dma.done.wait (%p2116_p7), %s226_s24, 512  }
  0x69   : > { %1649 = vsyncadd (%p2116_p7), %s226_s24, 4294966784  ;;  %p2117_p2 = scmp.ne.s32.totalorder %s2108_s23, 0 }
  0x6b   : > { %1651 = dma.done.wait (%p2117_p2), [#allocation8], 768  }
  0x6c   : > { %1653 = vsyncadd (%p2117_p2), [#allocation8], 4294966528  ;;  %s1933_s27 = scalar_lea.vmem [#allocation10], %s1208_s12  ;;  %p1212_p8 = scmp.ne.s32.totalorder %s1672_s18, 0 }
  0x6d   : > { %vm268_vm0 = vcmask (!%p1212_p8), 261120   ;;  %v1687_v0 = vmov (!%p1212_p8), 0.0  }
  0x6e   : > { %267 = sbr.rel (%p1212_p8) target bundleno = 117 (0x75), region = 52  ;;  %269 = vst.msk [vmem:[#allocation2] sm:$0xff] (!%p1212_p8), %vm268_vm0, %v1687_v0  ;;  %270 = vst.msk [vmem:[#allocation3] sm:$0xff] (!%p1212_p8), %vm268_vm0, %v1687_v0 }
  0x75 PF: > { %v274_v1 = vld [vmem:[#allocation7] sm:$0xff]  ;;  %v275_v2 = vld [vmem:[#allocation7 + $0x8] sm:$0xff]  ;;  %v1688_v3 = vmov 0.0|0.0   ;;  %vm1689_vm1 = vmmov 0   ;;  %v1690_v5 = vmov 0.0   ;;  %v357_v6 = vld [vmem:[#allocation9] sm:$0xff] }
  0x76   : > { %1342 = vmatprep.subr.bf16.mxu0 %v1688_v3  ;;  %v1937_v4 = vpack.c.bf16 %v275_v2, %v274_v1  ;;  %1274 = vmatprep.mubr.msk.f32.mxu0 %vm1689_vm1, %v1690_v5  ;;  %v358_v7 = vld [vmem:[#allocation9 + $0x8] sm:$0xff]  ;;  %v273_v8 = vld [vmem:[%s1923_s9] sm:$0xff]  ;;  %vm283_vm2 = vcmask 130048   ;;  %v360_v11 = vld [vmem:[#allocation9 + $0x18] sm:$0xff]  ;;  %vm361_vm3 = vcmask 261120   ;;  %s1691_s21 = smov 64  }
  0x77   : > { %1351 = vmatprep.subr.bf16.mxu1 %v1688_v3  ;;  %1292 = vmatprep.mubr.msk.f32.mxu1 %vm1689_vm1, %v1690_v5  ;;  %v1946_v9 = vpack.c.bf16 %v358_v7, %v357_v6  ;;  %v359_v10 = vld [vmem:[#allocation9 + $0x10] sm:$0xff]  ;;  %v271_v13 = vld [vmem:[#allocation2] sm:$0xff]  ;;  %v272_v19 = vld [vmem:[#allocation3] sm:$0xff]  ;;  %s1692_s22 = smov 32   ;;  %s1693_s29 = smov 96  }
  0x78   : > { %1344 = vmatpush3.bf16.msra.mxu0 %v1937_v4  ;;  %1353 = vmatpush3.bf16.msra.mxu1 %v1937_v4  ;;  %v1953_v12 = vpack.c.bf16 %v360_v11, %v359_v10  ;;  %v1968_v14 = vld [vmem:[%s2102_s3] ss:$0 sm:$0xff]  ;;  %v1216_v31 = vld [vmem:[%s1923_s9 + $0x8] sm:$0xff]  ;;  %s1237_s14 = sshll.u32 %s1672_s18, 9  ;;  %s1094_s28 = sshll.u32 %s1933_s27, 4  ;;  %s2047_s28 = int_to_ptr.vmem [resolvable:$true] %s1094_s28 }
  0x79   : > { %1345 = vmatprep.subr.bf16.mxu0 %v1688_v3  ;;  %1354 = vmatprep.subr.bf16.mxu1 %v1688_v3  ;;  %v1221_v53 = vld [vmem:[%s1923_s9 + $0x10] sm:$0xff]  ;;  %s2045_s10 = scalar_lea.hbm %s2103_s4, %s1237_s14  ;;  %s1080_s13 = scalar_lea.sflag [#allocation6], %s1919_s8 }
  0x7a   : > { %s1594_s12 = scalar_lea.vmem %s2047_s28, 512  ;;  %p2118_p1 = scmp.ne.s32.totalorder %s2114_s7, 0 }
  0x7b   : > { %1275 = vmatmul.mubr.msk.f32.vlgmr.msra.gmra.mrb[0].mxu0 %vm283_vm2, %v273_v8  ;;  %1293 = vmatmul.mubr.msk.f32.vlgmr.msra.gmra.mrb[0].mxu1 %vm283_vm2, %v1216_v31  ;;  %p1595_p12 = scmp.ne.s32.totalorder %s2047_s28, %s1594_s12  ;;  %s1694_s18 = smov [#allocation10]  }
  0x7c   : > { %1347 = vmatpush3.bf16.msra.mxu0 %v1946_v9  ;;  %1285 = vmatprep.mubr.msk.f32.mxu0 %vm1689_vm1, %v1690_v5  ;;  %s1598_s24 = sshll.u32 %s1694_s18, 4  ;;  %s1599_s24 = int_to_ptr.vmem [resolvable:$false] %s1598_s24 }
  0x7d   : > { %1348 = vmatprep.subr.bf16.mxu0 %v1688_v3  ;;  %1356 = vmatpush3.bf16.msra.mxu1 %v1946_v9  ;;  %p1596_p10 = pnand %p1595_p12, %p2118_p1  ;;  %p1601_p5 = scmp.lt.s32.totalorder %s2047_s28, %s1599_s24 }
  0x7e   : > { %1303 = vmatprep.mubr.msk.f32.mxu1 %vm1689_vm1, %v1690_v5  ;;  %1357 = vmatprep.subr.bf16.mxu1 %v1688_v3 }
  0x7f   : > { %p1597_p3 = pneg %p1596_p10 }
  0x80   : > { %1350 = vmatpush3.bf16.msra.mxu0 %v1953_v12 }
  0x81   : > { %1360 = vmatprep.subr.bf16.mxu0 %v1688_v3  ;;  %1359 = vmatpush3.bf16.msra.mxu1 %v1953_v12 }
  0x82   : > { %1369 = vmatprep.subr.bf16.mxu1 %v1688_v3 }
  0x83   : > { %1286 = vmatmul.mubr.msk.f32.vlgmr.msra.gmra.mrb[0].mxu0 %vm361_vm3, %v271_v13 }
  0x84   : > { %1362 = vmatpush3.bf16.msra.mxu0 %v1937_v4  ;;  %1310 = vmatprep.mubr.msk.f32.mxu0 %vm1689_vm1, %v1690_v5 }
  0x85   : > { %1363 = vmatprep.subr.bf16.mxu0 %v1688_v3 }
  0x87   : > { %1311 = vmatmul.mubr.msk.f32.vlgmr.msra.gmra.mrb[2].mxu0 %vm283_vm2, %v1221_v53 }
  0x88   : > { %1365 = vmatpush3.bf16.msra.mxu0 %v1946_v9  ;;  %1321 = vmatprep.mubr.msk.f32.mxu0 %vm1689_vm1, %v1690_v5 }
  0x89   : > { %1366 = vmatprep.subr.bf16.mxu0 %v1688_v3 }
  0x8c   : > { %1368 = vmatpush3.bf16.msra.mxu0 %v1953_v12 }
 0x156   : > { %v431_v15 = vpop.f32.mrb[0].mxu0 }
 0x157   : > { %v1378_v16 = vadd.f32 %v1968_v14, %v431_v15  ;;  %v1287_v17 = vpop.f32.mrb[1].mxu0 }
 0x159   : > { %1484 = vtanh.f32 %v1378_v16  ;;  %v436_v20 = vmul.f32 0.5, %v1378_v16  ;;  %v1226_v16 = vld [vmem:[%s1923_s9 + $0x18] sm:$0xff]  ;;  %s1600_s9 = scalar_lea.vmem %s1599_s24, 1024 }
 0x15a   : > { %p1602_p9 = scmp.lt.s32.totalorder %s1600_s9, %s1594_s12 }
 0x15b   : > { %1486 = vtanh.f32 %v436_v20 }
 0x15c   : > { %p1603_p11 = por %p1602_p9, %p1601_p5 }
 0x15e   : > { %p1604_p0 = pnand %p1603_p11, %p1597_p3 }
 0x163   : > { %v1485_v18 = vpop.eup %1484 }
 0x164   : > { %447 = vrot.lane.b32.xlu0 %v1485_v18, %s1691_s21 }
 0x165   : > { %v1487_v21 = vpop.eup %1486 }
 0x166   : > { %v438_v22 = vmul.f32 0.5, %v1487_v21 }
 0x168   : > { %442 = vrot.lane.b32.xlu0 %v272_v19, %s1692_s22  ;;  %v439_v23 = vadd.f32 0.5, %v438_v22 }
 0x1d6   : > { %v448_v24 = vpop.permute.xlu0 %447 }
 0x1d7   : > { %v450_v25 = vmul.f32 %v448_v24, %v439_v23 }
 0x1d9   : > { %452 = vrot.lane.b32.xlu1 %v450_v25, %s1692_s22 }
 0x1da   : > { %v443_v26 = vpop.permute.xlu0 %442 }
 0x1db   : > { %v445_v27 = vmul.f32 %v443_v26, %v439_v23 }
 0x24b   : > { %v453_v28 = vpop.permute.xlu1 %452 }
 0x24c   : > { %v455_v29 = vadd.f32 %v453_v28, %v445_v27 }
 0x24e   : > { %1488 = vtanh.f32 %v455_v29 }
 0x258   : > { %v1489_v30 = vpop.eup %1488 }
 0x259   : > { %458 = vrot.lane.b32.xlu1 %v1489_v30, %s1691_s21 }
 0x25d   : > { %463 = vrot.lane.b32.xlu1 %v455_v29, %s1693_s29 }
 0x2cb   : > { %v459_v32 = vpop.permute.xlu1 %458 }
 0x2cc   : > { %v461_v33 = vmul.f32 %v459_v32, %v439_v23 }
 0x2ce   : > { %468 = vrot.lane.b32.xlu0 %v461_v33, %s1692_s22 }
 0x2cf   : > { %v464_v34 = vpop.permute.xlu1 %463 }
 0x2d0   : > { %466 = vst.msk [vmem:[#allocation3] sm:$0xff] %vm361_vm3, %v464_v34 }
 0x2d7   : > { %v474_v35 = vld [vmem:[#allocation3] sm:$0xff] }
 0x2d8   : > { %643 = vrot.lane.b32.xlu1 %v474_v35, %s1692_s22 }
 0x340   : > { %v469_v36 = vpop.permute.xlu0 %468 }
 0x341   : > { %471 = vst.msk [vmem:[#allocation2] sm:$0xff] %vm361_vm3, %v469_v36  ;;  %472 = vst.msk [vmem:[%s1933_s27] sm:$0xff] %vm361_vm3, %v469_v36 }
 0x348   : > { %v473_v37 = vld [vmem:[#allocation2] sm:$0xff] }
 0x349   : > { %1304 = vmatmul.mubr.msk.f32.vlgmr.msra.gmra.mrb[0].mxu1 %vm361_vm3, %v473_v37 }
 0x34a   : > { %1371 = vmatpush3.bf16.msra.mxu1 %v1937_v4  ;;  %1328 = vmatprep.mubr.msk.f32.mxu1 %vm1689_vm1, %v1690_v5  ;;  %v644_v48 = vpop.permute.xlu1 %643 }
 0x34b   : > { %1372 = vmatprep.subr.bf16.mxu1 %v1688_v3 }
 0x34d   : > { %1329 = vmatmul.mubr.msk.f32.vlgmr.msra.gmra.mrb[2].mxu1 %vm283_vm2, %v1226_v16 }
 0x34e   : > { %1374 = vmatpush3.bf16.msra.mxu1 %v1946_v9  ;;  %1339 = vmatprep.mubr.msk.f32.mxu1 %vm1689_vm1, %v1690_v5 }
 0x34f   : > { %1375 = vmatprep.subr.bf16.mxu1 %v1688_v3 }
 0x352   : > { %1377 = vmatpush3.bf16.msra.mxu1 %v1953_v12 }
 0x41c   : > { %v632_v38 = vpop.f32.mrb[0].mxu1 }
 0x41d   : > { %v1379_v39 = vadd.f32 %v1968_v14, %v632_v38  ;;  %v1305_v40 = vpop.f32.mrb[1].mxu1 }
 0x41f   : > { %1490 = vtanh.f32 %v1379_v39  ;;  %v637_v42 = vmul.f32 0.5, %v1379_v39 }
 0x421   : > { %1492 = vtanh.f32 %v637_v42 }
 0x429   : > { %v1491_v41 = vpop.eup %1490 }
 0x42a   : > { %648 = vrot.lane.b32.xlu0 %v1491_v41, %s1691_s21 }
 0x42b   : > { %v1493_v43 = vpop.eup %1492 }
 0x42c   : > { %v639_v44 = vmul.f32 0.5, %v1493_v43 }
 0x42e   : > { %v640_v45 = vadd.f32 0.5, %v639_v44 }
 0x430   : > { %v646_v49 = vmul.f32 %v644_v48, %v640_v45 }
 0x49c   : > { %v649_v46 = vpop.permute.xlu0 %648 }
 0x49d   : > { %v651_v47 = vmul.f32 %v649_v46, %v640_v45 }
 0x49f   : > { %653 = vrot.lane.b32.xlu0 %v651_v47, %s1692_s22 }
 0x511   : > { %v654_v50 = vpop.permute.xlu0 %653 }
 0x512   : > { %v656_v51 = vadd.f32 %v654_v50, %v646_v49 }
 0x514   : > { %1494 = vtanh.f32 %v656_v51 }
 0x51e   : > { %v1495_v52 = vpop.eup %1494 }
 0x51f   : > { %659 = vrot.lane.b32.xlu1 %v1495_v52, %s1691_s21 }
 0x523   : > { %664 = vrot.lane.b32.xlu1 %v656_v51, %s1693_s29 }
 0x591   : > { %v660_v54 = vpop.permute.xlu1 %659 }
 0x592   : > { %v662_v55 = vmul.f32 %v660_v54, %v640_v45 }
 0x594   : > { %669 = vrot.lane.b32.xlu0 %v662_v55, %s1692_s22 }
 0x595   : > { %v665_v56 = vpop.permute.xlu1 %664 }
 0x596   : > { %667 = vst.msk [vmem:[#allocation3] sm:$0xff] %vm361_vm3, %v665_v56 }
 0x59d   : > { %v676_v57 = vld [vmem:[#allocation3] sm:$0xff] }
 0x59e   : > { %845 = vrot.lane.b32.xlu1 %v676_v57, %s1692_s22 }
 0x606   : > { %v670_v58 = vpop.permute.xlu0 %669 }
 0x607   : > { %672 = vst.msk [vmem:[#allocation2] sm:$0xff] %vm361_vm3, %v670_v58  ;;  %1220 = vst.msk [vmem:[%s1933_s27 + $0x8] sm:$0xff] %vm361_vm3, %v670_v58 }
 0x60e   : > { %v675_v59 = vld [vmem:[#allocation2] sm:$0xff] }
 0x60f   : > { %1322 = vmatmul.mubr.msk.f32.vlgmr.msra.gmra.mrb[2].mxu0 %vm361_vm3, %v675_v59 }
 0x610   : > { %v846_v8 = vpop.permute.xlu1 %845 }
 0x6e2   : > { %v834_v60 = vpop.f32.mrb[2].mxu0 }
 0x6e3   : > { %v1380_v61 = vadd.f32 %v1968_v14, %v834_v60  ;;  %v1323_v62 = vpop.f32.mrb[3].mxu0 }
 0x6e5   : > { %1496 = vtanh.f32 %v1380_v61  ;;  %v839_v0 = vmul.f32 0.5, %v1380_v61 }
 0x6e7   : > { %1498 = vtanh.f32 %v839_v0 }
 0x6ef   : > { %v1497_v63 = vpop.eup %1496 }
 0x6f0   : > { %850 = vrot.lane.b32.xlu0 %v1497_v63, %s1691_s21 }
 0x6f1   : > { %v1499_v1 = vpop.eup %1498 }
 0x6f2   : > { %v841_v2 = vmul.f32 0.5, %v1499_v1 }
 0x6f4   : > { %v842_v4 = vadd.f32 0.5, %v841_v2 }
 0x6f6   : > { %v848_v10 = vmul.f32 %v846_v8, %v842_v4 }
 0x762   : > { %v851_v6 = vpop.permute.xlu0 %850 }
 0x763   : > { %v853_v7 = vmul.f32 %v851_v6, %v842_v4 }
 0x765   : > { %855 = vrot.lane.b32.xlu0 %v853_v7, %s1692_s22 }
 0x7d7   : > { %v856_v11 = vpop.permute.xlu0 %855 }
 0x7d8   : > { %v858_v13 = vadd.f32 %v856_v11, %v848_v10 }
 0x7da   : > { %1500 = vtanh.f32 %v858_v13 }
 0x7e4   : > { %v1501_v15 = vpop.eup %1500 }
 0x7e5   : > { %861 = vrot.lane.b32.xlu1 %v1501_v15, %s1691_s21 }
 0x7e9   : > { %866 = vrot.lane.b32.xlu1 %v858_v13, %s1693_s29 }
 0x857   : > { %v862_v17 = vpop.permute.xlu1 %861 }
 0x858   : > { %v864_v18 = vmul.f32 %v862_v17, %v842_v4 }
 0x85a   : > { %871 = vrot.lane.b32.xlu0 %v864_v18, %s1692_s22 }
 0x85b   : > { %v867_v19 = vpop.permute.xlu1 %866 }
 0x85c   : > { %869 = vst.msk [vmem:[#allocation3] sm:$0xff] %vm361_vm3, %v867_v19 }
 0x863   : > { %v878_v20 = vld [vmem:[#allocation3] sm:$0xff] }
 0x864   : > { %1047 = vrot.lane.b32.xlu1 %v878_v20, %s1692_s22 }
 0x8cc   : > { %v872_v21 = vpop.permute.xlu0 %871 }
 0x8cd   : > { %874 = vst.msk [vmem:[#allocation2] sm:$0xff] %vm361_vm3, %v872_v21  ;;  %1225 = vst.msk [vmem:[%s1933_s27 + $0x10] sm:$0xff] %vm361_vm3, %v872_v21 }
 0x8d4   : > { %v877_v5 = vld [vmem:[#allocation2] sm:$0xff] }
 0x8d5   : > { %1340 = vmatmul.mubr.msk.f32.vlgmr.msra.gmra.mrb[2].mxu1 %vm361_vm3, %v877_v5 }
 0x8d6   : > { %v1048_v29 = vpop.permute.xlu1 %1047 }
 0x9a8   : > { %v1036_v3 = vpop.f32.mrb[2].mxu1 }
 0x9a9   : > { %v1381_v9 = vadd.f32 %v1968_v14, %v1036_v3  ;;  %v1341_v12 = vpop.f32.mrb[3].mxu1 }
 0x9ab   : > { %1502 = vtanh.f32 %v1381_v9  ;;  %v1041_v23 = vmul.f32 0.5, %v1381_v9 }
 0x9ad   : > { %1504 = vtanh.f32 %v1041_v23 }
 0x9b5   : > { %v1503_v22 = vpop.eup %1502 }
 0x9b6   : > { %1052 = vrot.lane.b32.xlu0 %v1503_v22, %s1691_s21 }
 0x9b7   : > { %v1505_v24 = vpop.eup %1504 }
 0x9b8   : > { %v1043_v25 = vmul.f32 0.5, %v1505_v24 }
 0x9ba   : > { %v1044_v26 = vadd.f32 0.5, %v1043_v25 }
 0x9bc   : > { %v1050_v30 = vmul.f32 %v1048_v29, %v1044_v26 }
 0xa28   : > { %v1053_v27 = vpop.permute.xlu0 %1052 }
 0xa29   : > { %v1055_v28 = vmul.f32 %v1053_v27, %v1044_v26 }
 0xa2b   : > { %1057 = vrot.lane.b32.xlu0 %v1055_v28, %s1692_s22 }
 0xa9d   : > { %v1058_v31 = vpop.permute.xlu0 %1057 }
 0xa9e   : > { %v1060_v14 = vadd.f32 %v1058_v31, %v1050_v30 }
 0xaa0   : > { %1506 = vtanh.f32 %v1060_v14 }
 0xaaa   : > { %v1507_v32 = vpop.eup %1506 }
 0xaab   : > { %1063 = vrot.lane.b32.xlu1 %v1507_v32, %s1691_s21 }
 0xaaf   : > { %1068 = vrot.lane.b32.xlu1 %v1060_v14, %s1693_s29 }
 0xb1d   : > { %v1064_v33 = vpop.permute.xlu1 %1063 }
 0xb1e   : > { %v1066_v34 = vmul.f32 %v1064_v33, %v1044_v26 }
 0xb20   : > { %1073 = vrot.lane.b32.xlu0 %v1066_v34, %s1692_s22 }
 0xb21   : > { %v1069_v35 = vpop.permute.xlu1 %1068 }
 0xb22   : > { %1071 = vst.msk [vmem:[#allocation3] sm:$0xff] %vm361_vm3, %v1069_v35 }
 0xb92   : > { %v1074_v36 = vpop.permute.xlu0 %1073 }
 0xb93   : > { %1076 = vst.msk [vmem:[#allocation2] sm:$0xff] %vm361_vm3, %v1074_v36  ;;  %1230 = vst.msk [vmem:[%s1933_s27 + $0x18] sm:$0xff] %vm361_vm3, %v1074_v36 }
 0xb94   : > { %1607 = shalt.err (!%p1604_p0)
}
 0xb95   : > { %s1608_s27 = scalar_lea.hbm %s2045_s10, 512  ;;  %s1612_s21 = scalar_lea.hbm %s2103_s4, 1024 }
 0xb96   : > { %p1609_p4 = scmp.ne.s32.totalorder %s2045_s10, %s1608_s27  ;;  %p1613_p7 = scmp.lt.u32.totalorder %s2045_s10, %s2103_s4 }
 0xb97   : > { %p1614_p2 = scmp.lt.u32.totalorder %s1612_s21, %s1608_s27  ;;  %p1616_p12 = scmp.lt.u32.totalorder %s1608_s27, %s2045_s10 }
 0xb98   : > { %p1610_p13 = pnand %p1609_p4, %p2118_p1 }
 0xb99   : > { %p1615_p8 = por %p1614_p2, %p1613_p7 }
 0xb9a   : > { %p1611_p6 = pneg %p1610_p13 }
 0xb9b   : > { %p1617_p10 = por %p1616_p12, %p1615_p8 }
 0xb9d   : > { %p1618_p3 = pnand %p1617_p10, %p1611_p6 }
 0xb9f   : > { %1621 = shalt.err (!%p1618_p3)
}
 0xba0   : > { %s1695_s14 = smov 128   ;;  %s1696_s5 = smov 8  }
 0xba1   : > { %1400 = dma.vmem_to_hbm [thread:$0]  (%p2118_p1), %s2047_s28, 512, %s2045_s10, %s1080_s13, %s1695_s14, %s1695_s14, %s1696_s5  }
 0xba2 PF: > { %s1109_s6 = sand.u32 1, %s1660_s15   ;;  %p2119_p5 = scmp.ne.s32.totalorder %s2111_s26, 0 }
 0xba3   : > { %p2120_p9 = scmp.ge.s32.totalorder %s1680_s20, 2  ;;  %s1110_s12 = scalar_lea.sflag [#allocation6], %s1109_s6 }
 0xba5   : > { %p1414_p11 = pnand %p2120_p9, %p2119_p5 }
 0xba7   : > { %1655 = dma.done.wait (!%p1414_p11), %s1110_s12, 512  }
 0xba8   : > { %1657 = vsyncadd (!%p1414_p11), %s1110_s12, 4294966784  ;;  %s21_s20 = sadd.s32 1, %s1680_s20   ;;  %s2121_s15 = smov %s1664_s16 }
 0xba9   : > { %p18_p0 = scmp.ge.s32.totalorder %s21_s20, 4   ;;  %s2122_s16 = smov %s1668_s17 }
 0xbaa   : > { %s2123_s17 = smov %s1870_s11  ;;  %s2124_s18 = smov %s1676_s19 }
 0xbab   : > { %s2125_s19 = smov %s2127_s30  ;;  %20 = sbr.rel (!%p18_p0) target bundleno = 7 (0x7), region = 99 }
 0xbb2   :  { %1115 = vsyncpa [#allocation5], 1 }
 0xbb3   :  { %1117 = vsyncpa [#allocation5 + $0x1], 1 }
 0xbb4   :  { %1118 = vsyncpa [#allocation8], 1 }
 0xbb5   :  { %1119 = vsyncpa [#allocation6], 1 }
 0xbb6   :  { %1121 = vsyncpa [#allocation6 + $0x1], 1 }

</bundles_post_ra>
